<compile_context>
chip_gen: v5e
topology: v5e:2x2
jax: 0.10.0
libtpu: 0.0.40
codegen_flags: <defaults>
</compile_context>

<pallas_src>
import functools
import math

import jax
import jax.numpy as jnp
from jax.experimental import pallas as pl
from jax.experimental.pallas import tpu as pltpu


def _round_up(x, m):
    return (x + m - 1) // m * m


def _pick_row_tile(ho, target=32):
    """Largest divisor of Ho <= target; prefer >=2 row tiles (v7x megacore)."""
    divs = [d for d in range(1, ho + 1) if ho % d == 0]
    th = max(d for d in divs if d <= target)
    if th == ho and ho > 1:
        smaller = [d for d in divs if d < ho]
        if smaller and max(smaller) >= 4:
            th = max(smaller)
    return th


def _dsconv_kernel(x_ref, wdw_ref, b1_ref, wpw_ref, b2_ref, o_ref, *,
                   stride, TH, Wo, Wpad, Cp, Coutp):
    """One (batch, row-tile) grid step.

    x_ref   : (1, Hp, Wpad, Cp)   padded NHWC input (resident per batch elem)
    wdw_ref : (3, 3, Cp)          depthwise weights, BN1 scale folded in (f32)
    b1_ref  : (1, Cp)             BN1 shift
    wpw_ref : (Cp, Coutp)         pointwise weights, BN2 scale folded in (bf16)
    b2_ref  : (1, Coutp)          BN2 shift
    o_ref   : (1, TH, Wo, Coutp)  output row tile
    """
    r = pl.program_id(1)
    in_rows = (TH - 1) * stride + 3
    row0 = pl.multiple_of(r * (TH * stride), TH * stride)
    x = x_ref[0, pl.ds(row0, in_rows), :, :]            # (in_rows, Wpad, Cp)
    wdw = wdw_ref[...]                                  # (3, 3, Cp)

    # ---- depthwise 3x3: columns via XLU rolls, rows via leading-dim slices;
    # ---- accumulator initialised from the first tap -------------------------
    if stride == 1:
        cols = [x,
                pltpu.roll(x, shift=Wpad - 1, axis=1),   # col j -> x[:, j+1]
                pltpu.roll(x, shift=Wpad - 2, axis=1)]   # col j -> x[:, j+2]
        acc = None
        for kh in range(3):
            for kw in range(3):
                tap = cols[kw][kh:kh + TH] * wdw[kh, kw]
                acc = tap if acc is None else acc + tap
    else:
        # stride == 2: de-interleave even/odd columns once (2 strided ops
        # instead of 9 strided taps), then every tap is contiguous / a roll.
        wh = Wpad // 2
        xe = x[:, 0::2, :]
        xo = x[:, 1::2, :]
        cols = [xe, xo, pltpu.roll(xe, shift=wh - 1, axis=1)]
        acc = None
        for kh in range(3):
            for kw in range(3):
                tap = cols[kw][kh:kh + 2 * (TH - 1) + 1:2] * wdw[kh, kw]
                acc = tap if acc is None else acc + tap

    # ---- BN1 shift + ReLU (scale already folded into wdw) ------------------
    y = jnp.maximum(acc[:, :Wo, :] + b1_ref[0], 0.0)

    # ---- pointwise 1x1 conv == MXU matmul (bf16 inputs, f32 accumulate) ----
    y2 = jnp.dot(y.reshape(TH * Wo, Cp).astype(jnp.bfloat16), wpw_ref[...],
                 preferred_element_type=jnp.float32)

    # ---- BN2 shift + ReLU ---------------------------------------------------
    z = jnp.maximum(y2 + b2_ref[0], 0.0)
    o_ref[0] = z.reshape(TH, Wo, Coutp).astype(o_ref.dtype)


def depthwise_separable_conv2d(x_nchw, params, stride=1, eps=1e-5):
    """Fused forward. x_nchw: (B, C, H, W) f32. Returns (B, C*stride, Ho, Wo)."""
    assert stride in (1, 2)
    B, C, H, W = x_nchw.shape
    w_dw = params["w_dw"]                       # (3, 3, C)
    w_pw = params["w_pw"]                       # (C, Cout)
    Cout = w_pw.shape[1]

    Ho = (H - 1) // stride + 1
    Wo = (W - 1) // stride + 1
    Hp = H + 2
    Wpad = _round_up(W + 2, 8)                  # sublane-aligned padded width
    Cp = _round_up(C, 128)                      # lane-dense channels
    Coutp = _round_up(Cout, 128)

    # NCHW -> NHWC + spatial padding (padding=1) + lane padding.
    # TODO(synk): in a full network keep activations NHWC (and pre-padded)
    # across layers to avoid this extra HBM pass per block.
    x = jnp.transpose(x_nchw, (0, 2, 3, 1)).astype(jnp.float32)
    xp = jnp.pad(x, ((0, 0), (1, 1), (1, Wpad - W - 1), (0, Cp - C)))

    # Fold eval-mode BatchNorm into conv-weight scale + per-channel shift.
    s1 = params["g1"] / jnp.sqrt(params["v1"] + eps)
    b1 = params["b1"] - params["m1"] * s1
    s2 = params["g2"] / jnp.sqrt(params["v2"] + eps)
    b2 = params["b2"] - params["m2"] * s2

    w_dw_p = jnp.pad((w_dw * s1[None, None, :]).astype(jnp.float32),
                     ((0, 0), (0, 0), (0, Cp - C)))
    w_pw_p = jnp.pad(w_pw * s2[None, :],
                     ((0, Cp - C), (0, Coutp - Cout))).astype(jnp.bfloat16)
    b1_p = jnp.pad(b1, (0, Cp - C)).reshape(1, Cp).astype(jnp.float32)
    b2_p = jnp.pad(b2, (0, Coutp - Cout)).reshape(1, Coutp).astype(jnp.float32)

    TH = _pick_row_tile(Ho)
    grid = (B, Ho // TH)

    kernel = functools.partial(_dsconv_kernel, stride=stride, TH=TH, Wo=Wo,
                               Wpad=Wpad, Cp=Cp, Coutp=Coutp)

    flops = 2 * B * Ho * Wo * Cp * Coutp + 18 * B * Ho * Wo * Cp
    bytes_accessed = ((xp.size + w_dw_p.size + b1_p.size + b2_p.size) * 4
                      + w_pw_p.size * 2 + B * Ho * Wo * Coutp * 4)
    cost = pl.CostEstimate(flops=flops, transcendentals=0,
                           bytes_accessed=bytes_accessed)

    out_nhwc = pl.pallas_call(
        kernel,
        out_shape=jax.ShapeDtypeStruct((B, Ho, Wo, Coutp), jnp.float32),
        grid_spec=pltpu.PrefetchScalarGridSpec(
            num_scalar_prefetch=0,
            grid=grid,
            in_specs=[
                pl.BlockSpec((1, Hp, Wpad, Cp), lambda b, r: (b, 0, 0, 0)),
                pl.BlockSpec((3, 3, Cp), lambda b, r: (0, 0, 0)),
                pl.BlockSpec((1, Cp), lambda b, r: (0, 0)),
                pl.BlockSpec((Cp, Coutp), lambda b, r: (0, 0)),
                pl.BlockSpec((1, Coutp), lambda b, r: (0, 0)),
            ],
            out_specs=pl.BlockSpec((1, TH, Wo, Coutp),
                                   lambda b, r: (b, r, 0, 0)),
        ),
        compiler_params=pltpu.CompilerParams(
            dimension_semantics=("parallel", "parallel"),
            vmem_limit_bytes=32 * 1024 * 1024),
        cost_estimate=cost,
    )(xp, w_dw_p, b1_p, w_pw_p, b2_p)

    return jnp.transpose(out_nhwc[..., :Cout], (0, 3, 1, 2))


def _reference(x_nchw, params, stride=1, eps=1e-5):
    """Pure-JAX reference (lax conv, f32) for correctness checking."""
    C = x_nchw.shape[1]
    Cout = params["w_pw"].shape[1]
    x = x_nchw.astype(jnp.float32)

    w_dw = params["w_dw"].reshape(3, 3, 1, C)  # HWIO, feature_group_count=C
    y = jax.lax.conv_general_dilated(
        x, w_dw, window_strides=(stride, stride), padding=((1, 1), (1, 1)),
        dimension_numbers=("NCHW", "HWIO", "NCHW"), feature_group_count=C)
    s1 = (params["g1"] / jnp.sqrt(params["v1"] + eps)).reshape(1, C, 1, 1)
    b1 = params["b1"].reshape(1, C, 1, 1) - params["m1"].reshape(1, C, 1, 1) * s1
    y = jnp.maximum(y * s1 + b1, 0.0)

    w_pw = params["w_pw"].reshape(1, 1, C, Cout)
    z = jax.lax.conv_general_dilated(
        y, w_pw, window_strides=(1, 1), padding=((0, 0), (0, 0)),
        dimension_numbers=("NCHW", "HWIO", "NCHW"))
    s2 = (params["g2"] / jnp.sqrt(params["v2"] + eps)).reshape(1, Cout, 1, 1)
    b2 = params["b2"].reshape(1, Cout, 1, 1) - params["m2"].reshape(1, Cout, 1, 1) * s2
    return jnp.maximum(z * s2 + b2, 0.0)


def _make_params(key, inplanes, stride):
    """Deterministic synthetic parameters matching the module's shapes."""
    outplanes = inplanes * stride
    ks = jax.random.split(key, 8)
    return {
        # depthwise conv3x3: PyTorch weight (C,1,3,3) -> stored as (3,3,C)
        "w_dw": 0.1 * jax.random.normal(ks[0], (3, 3, inplanes), jnp.float32),
        # BN1 params
        "g1": 1.0 + 0.1 * jax.random.normal(ks[1], (inplanes,), jnp.float32),
        "b1": 0.1 * jax.random.normal(ks[2], (inplanes,), jnp.float32),
        "m1": 0.1 * jax.random.normal(ks[3], (inplanes,), jnp.float32),
        "v1": 0.5 + jnp.abs(jax.random.normal(ks[4], (inplanes,), jnp.float32)),
        # pointwise conv1x1: PyTorch weight (Cout,C,1,1) -> stored as (C,Cout)
        "w_pw": 0.1 * jax.random.normal(ks[5], (inplanes, outplanes), jnp.float32),
        # BN2 params
        "g2": 1.0 + 0.1 * jax.random.normal(ks[6], (outplanes,), jnp.float32),
        "b2": 0.1 * jax.random.normal(ks[7], (outplanes,), jnp.float32),
        "m2": 0.05 * jnp.ones((outplanes,), jnp.float32),
        "v2": 1.5 * jnp.ones((outplanes,), jnp.float32),
    }


if __name__ == "__main__":
    B, C, H, W = 2, 4, 16, 16
    stride = 1  # outplanes = inplanes * stride

    key = jax.random.PRNGKey(0)
    kx, kp = jax.random.split(key)
    x = jax.random.normal(kx, (B, C, H, W), jnp.float32)
    params = _make_params(kp, C, stride)

    out = jax.block_until_ready(
        depthwise_separable_conv2d(x, params, stride=stride))
    ref = jax.block_until_ready(_reference(x, params, stride=stride))

    assert out.shape == ref.shape, (out.shape, ref.shape)
    max_err = float(jnp.max(jnp.abs(out - ref)))
    # Pointwise matmul uses bf16 MXU inputs with f32 accumulation -> allow a
    # few 1e-3 of absolute error vs the pure-f32 reference.
    assert jnp.allclose(out, ref, atol=3e-2, rtol=3e-2), max_err

    print("KERNEL_OK")
</pallas_src>

<mosaic_0001>
module attributes {stable_mosaic.version = 11 : i64} {
  func.func @_dsconv_kernel(%arg0: i32, %arg1: i32, %arg2: memref<1x18x24x128xf32, #tpu.memory_space<vmem>>, %arg3: memref<3x3x128xf32, #tpu.memory_space<vmem>>, %arg4: memref<1x128xf32, #tpu.memory_space<vmem>>, %arg5: memref<128x128xbf16, #tpu.memory_space<vmem>>, %arg6: memref<1x128xf32, #tpu.memory_space<vmem>>, %arg7: memref<1x8x16x128xf32, #tpu.memory_space<vmem>>) attributes {dimension_semantics = [#tpu.dimension_semantics<parallel>, #tpu.dimension_semantics<parallel>], iteration_bounds = array<i64: 2, 2>, scalar_prefetch = 0 : i64, scratch_operands = 0 : i64, tpu.core_type = #tpu.core_type<tc>, window_params = [{transform_indices = @transform_0, window_bounds = array<i64: 1, 18, 24, 128>}, {pipeline_mode = #tpu.pipeline_mode<synchronous>, transform_indices = @transform_1, window_bounds = array<i64: 3, 3, 128>}, {pipeline_mode = #tpu.pipeline_mode<synchronous>, transform_indices = @transform_2, window_bounds = array<i64: 1, 128>}, {pipeline_mode = #tpu.pipeline_mode<synchronous>, transform_indices = @transform_3, window_bounds = array<i64: 128, 128>}, {pipeline_mode = #tpu.pipeline_mode<synchronous>, transform_indices = @transform_4, window_bounds = array<i64: 1, 128>}, {transform_indices = @transform_5, window_bounds = array<i64: 1, 8, 16, 128>}]} {
    %c8_i32 = arith.constant 8 : i32
    %0 = arith.muli %arg1, %c8_i32 : i32
    %1 = tpu.assume_multiple %0, 8 : i32
    %c0 = arith.constant 0 : index
    %2 = arith.index_cast %1 : i32 to index
    %c0_0 = arith.constant 0 : index
    %c0_1 = arith.constant 0 : index
    %3 = vector.load %arg2[%c0, %2, %c0_0, %c0_1] : memref<1x18x24x128xf32, #tpu.memory_space<vmem>>, vector<1x10x24x128xf32>
    %4 = vector.shape_cast %3 : vector<1x10x24x128xf32> to vector<10x24x128xf32>
    %c0_2 = arith.constant 0 : index
    %c0_3 = arith.constant 0 : index
    %c0_4 = arith.constant 0 : index
    %5 = vector.load %arg3[%c0_2, %c0_3, %c0_4] : memref<3x3x128xf32, #tpu.memory_space<vmem>>, vector<3x3x128xf32>
    %c23_i32 = arith.constant 23 : i32
    %6 = tpu.dynamic_rotate %4 by %c23_i32 dim 1 : vector<10x24x128xf32>, i32 -> vector<10x24x128xf32>
    %c22_i32 = arith.constant 22 : i32
    %7 = tpu.dynamic_rotate %4 by %c22_i32 dim 1 : vector<10x24x128xf32>, i32 -> vector<10x24x128xf32>
    %8 = vector.extract_strided_slice %4 {offsets = [0, 0, 0], sizes = [8, 24, 128], strides = [1, 1, 1]} : vector<10x24x128xf32> to vector<8x24x128xf32>
    %9 = vector.extract_strided_slice %5 {offsets = [0, 0, 0], sizes = [1, 1, 128], strides = [1, 1, 1]} : vector<3x3x128xf32> to vector<1x1x128xf32>
    %10 = vector.shape_cast %9 : vector<1x1x128xf32> to vector<128xf32>
    %11 = vector.shape_cast %10 : vector<128xf32> to vector<1x1x128xf32>
    %12 = vector.broadcast %11 : vector<1x1x128xf32> to vector<8x24x128xf32>
    %13 = arith.mulf %8, %12 : vector<8x24x128xf32>
    %14 = vector.extract_strided_slice %6 {offsets = [0, 0, 0], sizes = [8, 24, 128], strides = [1, 1, 1]} : vector<10x24x128xf32> to vector<8x24x128xf32>
    %15 = vector.extract_strided_slice %5 {offsets = [0, 1, 0], sizes = [1, 1, 128], strides = [1, 1, 1]} : vector<3x3x128xf32> to vector<1x1x128xf32>
    %16 = vector.shape_cast %15 : vector<1x1x128xf32> to vector<128xf32>
    %17 = vector.shape_cast %16 : vector<128xf32> to vector<1x1x128xf32>
    %18 = vector.broadcast %17 : vector<1x1x128xf32> to vector<8x24x128xf32>
    %19 = arith.mulf %14, %18 : vector<8x24x128xf32>
    %20 = arith.addf %13, %19 : vector<8x24x128xf32>
    %21 = vector.extract_strided_slice %7 {offsets = [0, 0, 0], sizes = [8, 24, 128], strides = [1, 1, 1]} : vector<10x24x128xf32> to vector<8x24x128xf32>
    %22 = vector.extract_strided_slice %5 {offsets = [0, 2, 0], sizes = [1, 1, 128], strides = [1, 1, 1]} : vector<3x3x128xf32> to vector<1x1x128xf32>
    %23 = vector.shape_cast %22 : vector<1x1x128xf32> to vector<128xf32>
    %24 = vector.shape_cast %23 : vector<128xf32> to vector<1x1x128xf32>
    %25 = vector.broadcast %24 : vector<1x1x128xf32> to vector<8x24x128xf32>
    %26 = arith.mulf %21, %25 : vector<8x24x128xf32>
    %27 = arith.addf %20, %26 : vector<8x24x128xf32>
    %28 = vector.extract_strided_slice %4 {offsets = [1, 0, 0], sizes = [8, 24, 128], strides = [1, 1, 1]} : vector<10x24x128xf32> to vector<8x24x128xf32>
    %29 = vector.extract_strided_slice %5 {offsets = [1, 0, 0], sizes = [1, 1, 128], strides = [1, 1, 1]} : vector<3x3x128xf32> to vector<1x1x128xf32>
    %30 = vector.shape_cast %29 : vector<1x1x128xf32> to vector<128xf32>
    %31 = vector.shape_cast %30 : vector<128xf32> to vector<1x1x128xf32>
    %32 = vector.broadcast %31 : vector<1x1x128xf32> to vector<8x24x128xf32>
    %33 = arith.mulf %28, %32 : vector<8x24x128xf32>
    %34 = arith.addf %27, %33 : vector<8x24x128xf32>
    %35 = vector.extract_strided_slice %6 {offsets = [1, 0, 0], sizes = [8, 24, 128], strides = [1, 1, 1]} : vector<10x24x128xf32> to vector<8x24x128xf32>
    %36 = vector.extract_strided_slice %5 {offsets = [1, 1, 0], sizes = [1, 1, 128], strides = [1, 1, 1]} : vector<3x3x128xf32> to vector<1x1x128xf32>
    %37 = vector.shape_cast %36 : vector<1x1x128xf32> to vector<128xf32>
    %38 = vector.shape_cast %37 : vector<128xf32> to vector<1x1x128xf32>
    %39 = vector.broadcast %38 : vector<1x1x128xf32> to vector<8x24x128xf32>
    %40 = arith.mulf %35, %39 : vector<8x24x128xf32>
    %41 = arith.addf %34, %40 : vector<8x24x128xf32>
    %42 = vector.extract_strided_slice %7 {offsets = [1, 0, 0], sizes = [8, 24, 128], strides = [1, 1, 1]} : vector<10x24x128xf32> to vector<8x24x128xf32>
    %43 = vector.extract_strided_slice %5 {offsets = [1, 2, 0], sizes = [1, 1, 128], strides = [1, 1, 1]} : vector<3x3x128xf32> to vector<1x1x128xf32>
    %44 = vector.shape_cast %43 : vector<1x1x128xf32> to vector<128xf32>
    %45 = vector.shape_cast %44 : vector<128xf32> to vector<1x1x128xf32>
    %46 = vector.broadcast %45 : vector<1x1x128xf32> to vector<8x24x128xf32>
    %47 = arith.mulf %42, %46 : vector<8x24x128xf32>
    %48 = arith.addf %41, %47 : vector<8x24x128xf32>
    %49 = vector.extract_strided_slice %4 {offsets = [2, 0, 0], sizes = [8, 24, 128], strides = [1, 1, 1]} : vector<10x24x128xf32> to vector<8x24x128xf32>
    %50 = vector.extract_strided_slice %5 {offsets = [2, 0, 0], sizes = [1, 1, 128], strides = [1, 1, 1]} : vector<3x3x128xf32> to vector<1x1x128xf32>
    %51 = vector.shape_cast %50 : vector<1x1x128xf32> to vector<128xf32>
    %52 = vector.shape_cast %51 : vector<128xf32> to vector<1x1x128xf32>
    %53 = vector.broadcast %52 : vector<1x1x128xf32> to vector<8x24x128xf32>
    %54 = arith.mulf %49, %53 : vector<8x24x128xf32>
    %55 = arith.addf %48, %54 : vector<8x24x128xf32>
    %56 = vector.extract_strided_slice %6 {offsets = [2, 0, 0], sizes = [8, 24, 128], strides = [1, 1, 1]} : vector<10x24x128xf32> to vector<8x24x128xf32>
    %57 = vector.extract_strided_slice %5 {offsets = [2, 1, 0], sizes = [1, 1, 128], strides = [1, 1, 1]} : vector<3x3x128xf32> to vector<1x1x128xf32>
    %58 = vector.shape_cast %57 : vector<1x1x128xf32> to vector<128xf32>
    %59 = vector.shape_cast %58 : vector<128xf32> to vector<1x1x128xf32>
    %60 = vector.broadcast %59 : vector<1x1x128xf32> to vector<8x24x128xf32>
    %61 = arith.mulf %56, %60 : vector<8x24x128xf32>
    %62 = arith.addf %55, %61 : vector<8x24x128xf32>
    %63 = vector.extract_strided_slice %7 {offsets = [2, 0, 0], sizes = [8, 24, 128], strides = [1, 1, 1]} : vector<10x24x128xf32> to vector<8x24x128xf32>
    %64 = vector.extract_strided_slice %5 {offsets = [2, 2, 0], sizes = [1, 1, 128], strides = [1, 1, 1]} : vector<3x3x128xf32> to vector<1x1x128xf32>
    %65 = vector.shape_cast %64 : vector<1x1x128xf32> to vector<128xf32>
    %66 = vector.shape_cast %65 : vector<128xf32> to vector<1x1x128xf32>
    %67 = vector.broadcast %66 : vector<1x1x128xf32> to vector<8x24x128xf32>
    %68 = arith.mulf %63, %67 : vector<8x24x128xf32>
    %69 = arith.addf %62, %68 : vector<8x24x128xf32>
    %70 = vector.extract_strided_slice %69 {offsets = [0, 0, 0], sizes = [8, 16, 128], strides = [1, 1, 1]} : vector<8x24x128xf32> to vector<8x16x128xf32>
    %c0_5 = arith.constant 0 : index
    %c0_6 = arith.constant 0 : index
    %71 = vector.load %arg4[%c0_5, %c0_6] : memref<1x128xf32, #tpu.memory_space<vmem>>, vector<1x128xf32>
    %72 = vector.shape_cast %71 : vector<1x128xf32> to vector<128xf32>
    %73 = vector.shape_cast %72 : vector<128xf32> to vector<1x1x128xf32>
    %74 = vector.broadcast %73 : vector<1x1x128xf32> to vector<8x16x128xf32>
    %75 = arith.addf %70, %74 : vector<8x16x128xf32>
    %cst = arith.constant 0.000000e+00 : f32
    %76 = vector.broadcast %cst : f32 to vector<8x16x128xf32>
    %77 = arith.maximumf %75, %76 : vector<8x16x128xf32>
    %78 = vector.shape_cast %77 : vector<8x16x128xf32> to vector<128x128xf32>
    %79 = arith.truncf %78 : vector<128x128xf32> to vector<128x128xbf16>
    %c0_7 = arith.constant 0 : index
    %c0_8 = arith.constant 0 : index
    %80 = vector.load %arg5[%c0_7, %c0_8] : memref<128x128xbf16, #tpu.memory_space<vmem>>, vector<128x128xbf16>
    %cst_9 = arith.constant dense<0.000000e+00> : vector<128x128xf32>
    %81 = tpu.matmul %79, %80, %cst_9 {dimension_numbers = #tpu.dot_dimension_numbers<[1], [0], [0], [1], [0, 0, 1, 1], [], []>} : vector<128x128xbf16>, vector<128x128xbf16>, vector<128x128xf32> -> vector<128x128xf32>
    %c0_10 = arith.constant 0 : index
    %c0_11 = arith.constant 0 : index
    %82 = vector.load %arg6[%c0_10, %c0_11] : memref<1x128xf32, #tpu.memory_space<vmem>>, vector<1x128xf32>
    %83 = vector.shape_cast %82 : vector<1x128xf32> to vector<128xf32>
    %84 = vector.shape_cast %83 : vector<128xf32> to vector<1x128xf32>
    %85 = vector.broadcast %84 : vector<1x128xf32> to vector<128x128xf32>
    %86 = arith.addf %81, %85 : vector<128x128xf32>
    %cst_12 = arith.constant 0.000000e+00 : f32
    %87 = vector.broadcast %cst_12 : f32 to vector<128x128xf32>
    %88 = arith.maximumf %86, %87 : vector<128x128xf32>
    %89 = vector.shape_cast %88 : vector<128x128xf32> to vector<8x16x128xf32>
    %c0_13 = arith.constant 0 : index
    %c0_14 = arith.constant 0 : index
    %c0_15 = arith.constant 0 : index
    %c0_16 = arith.constant 0 : index
    %90 = vector.load %arg7[%c0_13, %c0_14, %c0_15, %c0_16] : memref<1x8x16x128xf32, #tpu.memory_space<vmem>>, vector<1x8x16x128xf32>
    %91 = vector.shape_cast %90 : vector<1x8x16x128xf32> to vector<8x16x128xf32>
    %92 = vector.shape_cast %89 : vector<8x16x128xf32> to vector<1x8x16x128xf32>
    tpu.vector_store %arg7[%c0_13, %c0_14, %c0_15, %c0_16], %92 {strides = array<i32>} : memref<1x8x16x128xf32, #tpu.memory_space<vmem>>, vector<1x8x16x128xf32>,
    return
  }
  func.func @transform_0(%arg0: i32, %arg1: i32) -> (i32, i32, i32, i32) {
    %c0_i32 = arith.constant 0 : i32
    %c0_i32_0 = arith.constant 0 : i32
    %c0_i32_1 = arith.constant 0 : i32
    %c0_i32_2 = arith.constant 0 : i32
    return %arg0, %c0_i32, %c0_i32_0, %c0_i32_1 : i32, i32, i32, i32
  }
  func.func @transform_1(%arg0: i32, %arg1: i32) -> (i32, i32, i32) {
    %c0_i32 = arith.constant 0 : i32
    %c0_i32_0 = arith.constant 0 : i32
    %c0_i32_1 = arith.constant 0 : i32
    %c0_i32_2 = arith.constant 0 : i32
    return %c0_i32, %c0_i32_0, %c0_i32_1 : i32, i32, i32
  }
  func.func @transform_2(%arg0: i32, %arg1: i32) -> (i32, i32) {
    %c0_i32 = arith.constant 0 : i32
    %c0_i32_0 = arith.constant 0 : i32
    %c0_i32_1 = arith.constant 0 : i32
    return %c0_i32, %c0_i32_0 : i32, i32
  }
  func.func @transform_3(%arg0: i32, %arg1: i32) -> (i32, i32) {
    %c0_i32 = arith.constant 0 : i32
    %c0_i32_0 = arith.constant 0 : i32
    %c0_i32_1 = arith.constant 0 : i32
    return %c0_i32, %c0_i32_0 : i32, i32
  }
  func.func @transform_4(%arg0: i32, %arg1: i32) -> (i32, i32) {
    %c0_i32 = arith.constant 0 : i32
    %c0_i32_0 = arith.constant 0 : i32
    %c0_i32_1 = arith.constant 0 : i32
    return %c0_i32, %c0_i32_0 : i32, i32
  }
  func.func @transform_5(%arg0: i32, %arg1: i32) -> (i32, i32, i32, i32) {
    %c0_i32 = arith.constant 0 : i32
    %c0_i32_0 = arith.constant 0 : i32
    %c0_i32_1 = arith.constant 0 : i32
    return %arg0, %arg1, %c0_i32, %c0_i32_0 : i32, i32, i32, i32
  }
}

</mosaic_0001>

<bundles_post_ra>
// kernel: tpu_custom_call.1
= control target key start
LH: loop header
LB: loop body
LE: loop exit
PB: predicated region body
PF: predicated region fallthrough
CT: control target
= control target key end

     0   :  { %s2356_s0 = inlined_call_operand.hbm [shape: f32[2,18,24,128], index: 0, kind: input, shape index: {}]   ;;  %s2357_s1 = inlined_call_operand.hbm [shape: f32[3,3,128], index: 1, kind: input, shape index: {}]   ;;  %s2358_s2 = inlined_call_operand.vmem [shape: f32[1,128], index: 2, kind: input, shape index: {}]   ;;  %s2359_s3 = inlined_call_operand.hbm [shape: bf16[128,128], index: 3, kind: input, shape index: {}]   ;;  %s2360_s4 = inlined_call_operand.vmem [shape: f32[1,128], index: 4, kind: input, shape index: {}]   ;;  %s2361_s5 = inlined_call_operand.hbm [shape: f32[2,16,16,128], index: 5, kind: output, shape index: {}]  }
   0x1   :  { %2384 = sst [smem:[#allocation42_spill]] %s2357_s1 }
   0x2   :  { %2385 = sst [smem:[#allocation43_spill]] %s2359_s3 }
   0x3   :  { %2386 = sst [smem:[#allocation44_spill]] %s2361_s5 }
   0x4   :  { %10 = vsyncpa [#allocation3], 0 }
   0x5   :  { %12 = vsyncpa [#allocation3 + $0x1], 0 }
   0x6   :  { %13 = vsyncpa [#allocation6], 0 }
   0x7   :  { %14 = vsyncpa [#allocation4], 0 }
   0x8   :  { %16 = vsyncpa [#allocation4 + $0x1], 0  ;;  %s1509_s18 = smov 0   ;;  %s1511_s19 = smov 0  }
   0x9   :  { %s1513_s20 = smov 0   ;;  %s1515_s21 = smov 0  }
   0xa   :  { %s1517_s22 = smov 0   ;;  %s1519_s23 = smov 0  }
   0xb   :  { %s1521_s24 = smov 0   ;;  %s1523_s25 = smov 0  }
   0xc   :  { %s1525_s26 = smov 0   ;;  %s1527_s27 = smov 0  }
   0xd   :  { %s1529_s28 = smov 0  }
   0xe LB: > { %2387 = sst [smem:[#allocation12_spill]] %s1429_s18  ;;  %s1034_s29 = sadd.s32 4294967295, %s1469_s28   ;;  %s1469_s28 = sphi %s1529_s28, %s22_s28   ;;  %s1465_s27 = sphi %s1527_s27, %s2464_s27   ;;  %s1461_s26 = sphi %s1525_s26, %s2455_s26   ;;  %s1457_s25 = sphi %s1523_s25, %s2463_s25   ;;  %s1453_s24 = sphi %s1521_s24, %s2454_s24   ;;  %s1449_s23 = sphi %s1519_s23, %s2462_s23   ;;  %s1445_s22 = sphi %s1517_s22, %s2461_s22   ;;  %s1441_s21 = sphi %s1515_s21, %s2460_s21   ;;  %s1437_s20 = sphi %s1513_s20, %s2459_s20   ;;  %s1433_s19 = sphi %s1511_s19, %s2458_s19   ;;  %s1429_s18 = sphi %s1509_s18, %s2457_s18  }
   0xf   : > { %2388 = sst [smem:[#allocation13_spill]] %s1457_s25  ;;  %s1035_s30 = sadd.s32 4294967294, %s1469_s28  }
  0x10   : > { %2389 = sst [smem:[#allocation14_spill]] %s1461_s26  ;;  %p54_p0 = scmp.ne.s32.totalorder %s1445_s22, %s1441_s21 }
  0x11   : > { %p1565_p1 = scmp.eq.s32.totalorder %s1034_s29, 0  ;;  %p163_p2 = scmp.ne.s32.totalorder %s1437_s20, %s1433_s19 }
  0x12   : > { %p164_p3 = scmp.eq.s32.totalorder %s1034_s29, 3  ;;  %p169_p5 = scmp.ne.s32.totalorder %s1433_s19, %s1429_s18 }
  0x13   : > { %p1573_p4 = por %p1565_p1, %p54_p0  ;;  %p170_p7 = scmp.eq.s32.totalorder %s1035_s30, 3 }
  0x14   : > { %p1579_p6 = por %p164_p3, %p163_p2  ;;  %p1036_p8 = scmp.ge.s32.totalorder %s1469_s28, 1 }
  0x15   : > { %p177_p9 = scmp.lt.s32.totalorder %s1469_s28, 5  ;;  %p1585_p10 = por %p170_p7, %p169_p5 }
  0x16   : > { %s2392_s8 = scalar_select %p1579_p6, 1, 0 }
  0x17   : > { %s2394_s9 = scalar_select %p1585_p10, 1, 0 }
  0x18   : > { %2393 = sst [smem:[#allocation15_spill]] %s2392_s8  ;;  %p1589_p11 = pnand %p1036_p8, %p177_p9 }
  0x19   : > { %2395 = sst [smem:[#allocation16_spill]] %s2394_s9  ;;  %s1471_s14 = smov [#allocation5]  }
  0x1a   : > { %s2397_s1 = sld [smem:[#allocation42_spill]]  ;;  %p1134_p12 = pneg %p1589_p11 }
  0x1b   : > { %s190_s15 = sshll.u32 %s1471_s14, 4  ;;  %s2398_s3 = sld [smem:[#allocation43_spill]]  ;;  %s191_s15 = int_to_ptr.vmem [resolvable:$true] %s190_s15 }
  0x1c   : > { %p1135_p13 = pnand %p1134_p12, %p1565_p1  ;;  %s1472_s29 = smov 64  }
  0x1d   : > { %s1473_s30 = smov 4   ;;  %s1474_s11 = smov [#allocation7]  }
  0x1e   : > { %s207_s12 = sshll.u32 %s1474_s11, 4  ;;  %s31_s14 = sadd.s32 1, %s1461_s26  ;;  %s208_s12 = int_to_ptr.vmem [resolvable:$true] %s207_s12 }
  0x1f   : > { %p32_p0 = scmp.ge.s32.totalorder %s31_s14, 2  ;;  %s34_s16 = sadd.s32 1, %s1465_s27 }
  0x20   : > { %s188_s13 = sshll.u32 %s2397_s1, 4  ;;  %s41_s17 = sadd.s32 1, %s1449_s23  ;;  %s189_s13 = int_to_ptr.hbm [resolvable:$true] %s188_s13 }
  0x21   : > { %s205_s21 = sshll.u32 %s2398_s3, 4  ;;  %p48_p2 = scmp.ne.s32.totalorder %s1449_s23, %s1445_s22  ;;  %s206_s21 = int_to_ptr.hbm [resolvable:$true] %s205_s21 }
  0x22   : > { %1137 = dma.hbm_to_vmem [thread:$0]  (!%p1135_p13), %s189_s13, 192, %s191_s15, [#allocation6], %s1472_s29, %s1472_s29, %s1473_s30  }
  0x23   : > { %1140 = dma.hbm_to_vmem [thread:$0]  (!%p1135_p13), %s206_s21, 1024, %s208_s12, [#allocation6], %s1472_s29, %s1472_s29, %s1473_s30  }
  0x24   : > { %s2466_s14 = smov (%p32_p0, %s31_s14), 0  ;;  %s2468_s16 = smov (!%p32_p0, %s34_s16), %s1465_s27 }
  0x25   : > { %2399 = sst [smem:[#allocation17_spill]] %s2466_s14  ;;  %p49_p3 = scmp.eq.s32.totalorder %s1469_s28, 0 }
  0x26   : > { %s149_s13 = ssub.s32 %s1461_s26, %s2466_s14  ;;  %p36_p5 = scmp.ge.s32.totalorder %s2468_s16, 2 }
  0x27   : > { %s153_s15 = sadd.s32 1, %s1437_s20  ;;  %p1615_p7 = por %p49_p3, %p48_p2 }
  0x28   : > { %p1151_p8 = scmp.lt.s32.totalorder %s1469_s28, 4  ;;  %s2470_s16 = smov (%p36_p5, %s2468_s16), 0 }
  0x29   : > { %2401 = sst [smem:[#allocation18_spill]] %s2470_s16  ;;  %s224_s21 = sand.u32 1, %s1449_s23  }
  0x2a   : > { %s1120_s29 = smul.u32 432, %s1465_s27  ;;  %s38_s30 = ssub.s32 %s1465_s27, %s2470_s16 }
  0x2b   : > { %p39_p9 = scmp.eq.s32.totalorder %s38_s30, 0  ;;  %s150_s12 = sor.u32 %s149_s13, %s38_s30 }
  0x2c   : > { %p151_p12 = scmp.eq.s32.totalorder %s150_s12, 0  ;;  %s1119_s1 = smul.u32 432, %s224_s21 }
  0x2d   : > { %s1627_s3 = scalar_select %p39_p9, %s1449_s23, %s41_s17  }
  0x2e   : > { %s1630_s14 = scalar_select %p151_p12, %s1437_s20, %s153_s15  }
  0x2f   : > { %s233_s18 = scalar_lea.hbm %s2356_s0, %s1120_s29  ;;  %s228_s5 = scalar_lea.vmem [#allocation2], %s1119_s1 }
  0x30   : > { %s234_s8 = sshll.u32 %s233_s18, 4  ;;  %s236_s25 = sshll.u32 %s228_s5, 4  ;;  %s235_s8 = int_to_ptr.hbm [resolvable:$true] %s234_s8  ;;  %s237_s25 = int_to_ptr.vmem [resolvable:$true] %s236_s25 }
  0x31   : > { %p1142_p13 = pnand %p1151_p8, %p1615_p7  ;;  %s225_s16 = scalar_lea.sflag [#allocation3], %s224_s21 }
  0x32   : > { %s1475_s13 = smov 128   ;;  %s1476_s30 = smov 8  }
  0x33   : > { %1144 = dma.hbm_to_vmem [thread:$0]  (!%p1142_p13), %s235_s8, 6912, %s237_s25, %s225_s16, %s1475_s13, %s1475_s13, %s1476_s30  }
  0x34   : > { %248 = sbr.rel (%p1589_p11) target bundleno = 332 (0x14c), region = 40 }
  0x39   : > { %s250_s17 = sand.u32 1, %s1445_s22  }
  0x3a   : > { %s1121_s26 = smul.u32 432, %s250_s17  ;;  %s251_s9 = scalar_lea.sflag [#allocation3], %s250_s17 }
  0x3c   : > { %s254_s18 = scalar_lea.vmem [#allocation2], %s1121_s26 }
  0x3d   : > { %1416 = dma.done.wait (%p1573_p4), %s251_s9, 6912  }
  0x3e   : > { %1418 = vsyncadd (%p1573_p4), %s251_s9, 4294960384 }
  0x3f   : > { %1420 = dma.done.wait (%p1565_p1), [#allocation6], 1216  }
  0x40   : > { %1422 = vsyncadd (%p1565_p1), [#allocation6], 4294966080  ;;  %s1046_s1 = smul.u32 192, %s1453_s24  ;;  %v359_v0 = vlaneseq  ;;  %v1093_v1 = vld [vmem:[#allocation7 + $0x38] sm:$0xff]  ;;  %v1092_v2 = vld [vmem:[#allocation7 + $0x30] sm:$0xff]  ;;  %s289_s7 = sand.u32 1, %s1433_s19  }
  0x41   : > { %826 = vmatpush.bf16.msra.mxu0 %v1093_v1  ;;  %1095 = vmatpush.bf16.msra.mxu1 %v1093_v1  ;;  %v1091_v15 = vld [vmem:[#allocation7 + $0x28] sm:$0xff]  ;;  %v326_v16 = vld [vmem:[#allocation5] sm:$0x7]  ;;  %v1090_v28 = vld [vmem:[#allocation7 + $0x20] sm:$0xff]  ;;  %s1044_s16 = sshll.u32 %s289_s7, 7  ;;  %s2448_s11 = sld [smem:[#allocation13_spill]] }
  0x42   : > { %s1651_s5 = scalar_lea.vmem %s254_s18, %s1046_s1 [#allocation2]  ;;  %v1654_v4 = vshrl.u32 %v359_v0, 7  ;;  %1096 = vmatpush.bf16.msra.mxu2 %v1093_v1  ;;  %1097 = vmatpush.bf16.msra.mxu3 %v1093_v1  ;;  %v1693_v32 = vperm.slane %v326_v16, 0  ;;  %v1704_v36 = vperm.slane %v326_v16, 1  ;;  %v327_v37 = vld [vmem:[#allocation5 + $0x4] sm:$0x7]  ;;  %v1722_v50 = vperm.slane %v326_v16, 2 }
  0x43   : > { %v296_v3 = vld [vmem:[%s1651_s5] sm:$0xff]  ;;  %v297_v5 = vld [vmem:[%s1651_s5 + $0x8] sm:$0xff]  ;;  %v298_v6 = vld [vmem:[%s1651_s5 + $0x10] sm:$0xff]  ;;  %v1726_v54 = vperm.slane %v327_v37, 0  ;;  %v1732_v59 = vperm.slane %v327_v37, 1  ;;  %s2268_s15 = scalar_lea.vmem [#allocation8], %s1044_s16 }
  0x44   : > { %v1659_v7 = vld [vmem:[%s1651_s5 + $0x18] sm:$0xff]  ;;  %v1662_v8 = vld [vmem:[%s1651_s5 + $0x20] sm:$0xff]  ;;  %v1665_v9 = vld [vmem:[%s1651_s5 + $0x28] sm:$0xff]  ;;  %v329_v12 = vrot.slane %v296_v3, 1  ;;  %v339_v13 = vrot.slane %v297_v5, 1  ;;  %v349_v14 = vrot.slane %v298_v6, 1  ;;  %v434_v40 = vmul.f32 %v1693_v32, %v296_v3 }
  0x45   : > { %v1668_v10 = vld [vmem:[%s1651_s5 + $0x30] sm:$0xff]  ;;  %v1671_v11 = vld [vmem:[%s1651_s5 + $0x38] sm:$0xff]  ;;  %827 = vmatpush.bf16.msra.mxu0 %v1092_v2  ;;  %1098 = vmatpush.bf16.msra.mxu1 %v1092_v2  ;;  %v330_v17 = vrot.slane %v1659_v7, 1  ;;  %v340_v18 = vrot.slane %v1662_v8, 1  ;;  %vm361_vm0 = vcmp.lt.s32.totalorder %v1654_v4, 7  ;;  %v1677_v19 = vld [vmem:[%s1651_s5 + $0x40] sm:$0xff]  ;;  %v435_v41 = vmul.f32 %v1693_v32, %v297_v5 }
  0x46   : > { %1099 = vmatpush.bf16.msra.mxu2 %v1092_v2  ;;  %1100 = vmatpush.bf16.msra.mxu3 %v1092_v2  ;;  %v331_v20 = vrot.slane %v1668_v10, 1  ;;  %v341_v21 = vrot.slane %v1671_v11, 1  ;;  %v350_v22 = vrot.slane %v1665_v9, 1  ;;  %v382_v23 = vrot.slane %v296_v3, 2  ;;  %2402 = vst [vmem:[#allocation19_spill] sm:$0xff] %v1704_v36  ;;  %v1089_v46 = vld [vmem:[#allocation7 + $0x18] sm:$0xff] }
  0x47   : > { %vm412_vm1 = vcmp.lt.s32.totalorder %v1654_v4, 6  ;;  %v362_v24 = vsel %vm361_vm0, %v339_v13, %v349_v14  ;;  %v372_v25 = vsel %vm361_vm0, %v329_v12, %v339_v13  ;;  %v392_v26 = vrot.slane %v297_v5, 2  ;;  %2403 = vst [vmem:[#allocation20_spill] sm:$0xff] %v1722_v50  ;;  %v328_v55 = vld [vmem:[#allocation5 + $0x8] sm:$0x7]  ;;  %v1088_v0 = vld [vmem:[#allocation7 + $0x10] sm:$0xff] }
  0x48   : > { %v402_v27 = vrot.slane %v298_v6, 2  ;;  %v351_v29 = vrot.slane %v1677_v19, 1  ;;  %v1690_v30 = vsel %vm361_vm0, %v330_v17, %v340_v18  ;;  %v383_v31 = vrot.slane %v1659_v7, 2  ;;  %s1094_s21 = sshll.u32 %s1453_s24, 4  ;;  %s1082_s29 = sshll.u32 %s2448_s11, 5 }
  0x49   : > { %828 = vmatpush.bf16.msra.mxu0 %v1091_v15  ;;  %1101 = vmatpush.bf16.msra.mxu1 %v1091_v15  ;;  %v1697_v33 = vsel %vm361_vm0, %v340_v18, %v350_v22  ;;  %v1701_v34 = vsel %vm361_vm0, %v331_v20, %v341_v21  ;;  %v384_v35 = vrot.slane %v1668_v10, 2  ;;  %v393_v38 = vrot.slane %v1662_v8, 2  ;;  %v1087_v22 = vld [vmem:[#allocation7 + $0x8] sm:$0xff]  ;;  %s920_s12 = sadd.s32 %s1094_s21, %s1082_s29  ;;  %s2449_s26 = sld [smem:[#allocation44_spill]] }
  0x4a   : > { %1102 = vmatpush.bf16.msra.mxu2 %v1091_v15  ;;  %1103 = vmatpush.bf16.msra.mxu3 %v1091_v15  ;;  %v403_v39 = vrot.slane %v1665_v9, 2  ;;  %v413_v42 = vsel %vm412_vm1, %v392_v26, %v402_v27  ;;  %v423_v43 = vsel %vm412_vm1, %v382_v23, %v392_v26  ;;  %v451_v44 = vmul.f32 %v1704_v36, %v372_v25  ;;  %s1083_s13 = sshll.u32 %s920_s12, 3  ;;  %s923_s24 = sshll.u32 %s2268_s15, 4  ;;  %s924_s24 = int_to_ptr.vmem [resolvable:$true] %s923_s24 }
  0x4b   : > { %v452_v45 = vmul.f32 %v1704_v36, %v362_v24  ;;  %v1718_v47 = vsel %vm361_vm0, %v341_v21, %v351_v29  ;;  %v394_v48 = vrot.slane %v1671_v11, 2  ;;  %v404_v49 = vrot.slane %v1677_v19, 2  ;;  %s908_s25 = scalar_lea.sflag [#allocation4], %s289_s7 }
  0x4c   : > { %v438_v51 = vmul.f32 %v1693_v32, %v1668_v10  ;;  %v467_v52 = vadd.f32 %v451_v44, %v434_v40  ;;  %v455_v56 = vmul.f32 %v1704_v36, %v1701_v34  ;;  %v484_v57 = vmul.f32 %v1722_v50, %v423_v43  ;;  %v1086_v40 = vld [vmem:[#allocation7] sm:$0xff] }
  0x4d   : > { %829 = vmatpush.bf16.msra.mxu0 %v1090_v28  ;;  %1104 = vmatpush.bf16.msra.mxu1 %v1090_v28  ;;  %v468_v53 = vadd.f32 %v452_v45, %v435_v41  ;;  %v485_v58 = vmul.f32 %v1722_v50, %v413_v42  ;;  %v414_v60 = vsel %vm412_vm1, %v393_v38, %v403_v39  ;;  %v1744_v5 = vperm.slane %v327_v37, 2  ;;  %v1798_v44 = vld [vmem:[%s1651_s5 + $0x68] sm:$0xff] }
  0x4e   : > { %1105 = vmatpush.bf16.msra.mxu2 %v1090_v28  ;;  %1106 = vmatpush.bf16.msra.mxu3 %v1090_v28  ;;  %v424_v61 = vsel %vm412_vm1, %v383_v31, %v393_v38  ;;  %v439_v62 = vmul.f32 %v1693_v32, %v1671_v11  ;;  %v456_v63 = vmul.f32 %v1704_v36, %v1718_v47  ;;  %v1756_v13 = vperm.slane %v328_v55, 0 }
  0x4f   : > { %v500_v1 = vadd.f32 %v484_v57, %v467_v52  ;;  %v501_v2 = vadd.f32 %v485_v58, %v468_v53  ;;  %v517_v3 = vmul.f32 %v1726_v54, %v1659_v7  ;;  %v1748_v6 = vsel %vm412_vm1, %v394_v48, %v404_v49  ;;  %v1803_v49 = vld [vmem:[%s1651_s5 + $0x48] sm:$0xff]  ;;  %v307_v52 = vld [vmem:[%s1651_s5 + $0x58] sm:$0xff]  ;;  %v310_v57 = vld [vmem:[%s1651_s5 + $0x70] sm:$0xff]  ;;  %s2450_s9 = smov %s2449_s26  ;;  %s922_s1 = scalar_lea.hbm %s2449_s26, %s1083_s13 }
  0x50   : > { %v1752_v9 = vsel %vm412_vm1, %v384_v35, %v394_v48  ;;  %v518_v12 = vmul.f32 %v1726_v54, %v1662_v8  ;;  %v471_v14 = vadd.f32 %v455_v56, %v438_v51  ;;  %v550_v16 = vmul.f32 %v1732_v59, %v1690_v30  ;;  %v1806_v51 = vld [vmem:[%s1651_s5 + $0x50] sm:$0xff]  ;;  %s1363_s11 = scalar_lea.hbm %s2450_s9, 512 }
  0x51   : > { %830 = vmatpush.bf16.msra.mxu0 %v1089_v46  ;;  %1107 = vmatpush.bf16.msra.mxu1 %v1089_v46  ;;  %v533_v15 = vadd.f32 %v517_v3, %v500_v1  ;;  %v551_v17 = vmul.f32 %v1732_v59, %v1697_v33  ;;  %v472_v18 = vadd.f32 %v456_v63, %v439_v62  ;;  %v1768_v26 = vperm.slane %v328_v55, 1 }
  0x52   : > { %1108 = vmatpush.bf16.msra.mxu2 %v1089_v46  ;;  %1109 = vmatpush.bf16.msra.mxu3 %v1089_v46  ;;  %v534_v19 = vadd.f32 %v518_v12, %v501_v2  ;;  %v583_v20 = vmul.f32 %v1744_v5, %v424_v61  ;;  %v584_v21 = vmul.f32 %v1744_v5, %v414_v60  ;;  %v1774_v31 = vperm.slane %v328_v55, 2 }
  0x53   : > { %v488_v23 = vmul.f32 %v1722_v50, %v1752_v9  ;;  %v489_v24 = vmul.f32 %v1722_v50, %v1748_v6  ;;  %v566_v25 = vadd.f32 %v550_v16, %v533_v15  ;;  %v616_v28 = vmul.f32 %v1756_v13, %v1668_v10 }
  0x54   : > { %v567_v27 = vadd.f32 %v551_v17, %v534_v19  ;;  %v617_v29 = vmul.f32 %v1756_v13, %v1671_v11  ;;  %v1778_v35 = vmul.f32 %v1704_v36, %v1690_v30  ;;  %v1782_v37 = vmul.f32 %v1704_v36, %v1697_v33  ;;  %v1795_v33 = vld [vmem:[%s1651_s5 + $0x60] sm:$0xff] }
  0x55   : > { %831 = vmatpush.bf16.msra.mxu0 %v1088_v0  ;;  %1110 = vmatpush.bf16.msra.mxu1 %v1088_v0  ;;  %v599_v38 = vadd.f32 %v583_v20, %v566_v25  ;;  %v649_v39 = vmul.f32 %v1768_v26, %v1701_v34  ;;  %v1787_v41 = vmul.f32 %v1722_v50, %v424_v61  ;;  %v1819_v61 = vld [vmem:[%s2358_s2] ss:$0 sm:$0xff]  ;;  %v333_v62 = vrot.slane %v1795_v33, 1 }
  0x56   : > { %1111 = vmatpush.bf16.msra.mxu2 %v1088_v0  ;;  %1112 = vmatpush.bf16.msra.mxu3 %v1088_v0  ;;  %v1790_v42 = vmul.f32 %v1722_v50, %v414_v60  ;;  %v600_v30 = vadd.f32 %v584_v21, %v567_v27  ;;  %v650_v43 = vmul.f32 %v1768_v26, %v1718_v47  ;;  %v343_v63 = vrot.slane %v1798_v44, 1 }
  0x57   : > { %v504_v45 = vadd.f32 %v488_v23, %v471_v14  ;;  %v632_v46 = vadd.f32 %v616_v28, %v599_v38  ;;  %v682_v48 = vmul.f32 %v1774_v31, %v1752_v9  ;;  %v505_v53 = vadd.f32 %v489_v24, %v472_v18 }
  0x58   : > { %v633_v55 = vadd.f32 %v617_v29, %v600_v30  ;;  %v683_v56 = vmul.f32 %v1774_v31, %v1748_v6  ;;  %v1814_v58 = vmul.f32 %v1732_v59, %v1701_v34  ;;  %v332_v1 = vrot.slane %v1803_v49, 1 }
  0x59   : > { %832 = vmatpush.bf16.msra.mxu0 %v1087_v22  ;;  %1113 = vmatpush.bf16.msra.mxu1 %v1087_v22  ;;  %v665_v60 = vadd.f32 %v649_v39, %v632_v46  ;;  %v342_v2 = vrot.slane %v1806_v51, 1  ;;  %v352_v3 = vrot.slane %v307_v52, 1  ;;  %v1827_v34 = vmul.f32 %v1732_v59, %v1718_v47 }
  0x5a   : > { %1114 = vmatpush.bf16.msra.mxu2 %v1087_v22  ;;  %1115 = vmatpush.bf16.msra.mxu3 %v1087_v22  ;;  %v666_v0 = vadd.f32 %v650_v43, %v633_v55  ;;  %v353_v14 = vrot.slane %v310_v57, 1  ;;  %v385_v15 = vrot.slane %v1803_v49, 2  ;;  %v386_v17 = vrot.slane %v1795_v33, 2  ;;  %v1865_v43 = vld [vmem:[%s1651_s5 + $0x78] sm:$0xff] }
  0x5b   : > { %2404 = vst [vmem:[#allocation21_spill] sm:$0xff] %v1827_v34  ;;  %v698_v12 = vadd.f32 %v682_v48, %v665_v60  ;;  %v395_v18 = vrot.slane %v1806_v51, 2  ;;  %v396_v19 = vrot.slane %v1798_v44, 2  ;;  %v1835_v20 = vmul.f32 %v1744_v5, %v1752_v9 }
  0x5c   : > { %v699_v16 = vadd.f32 %v683_v56, %v666_v0  ;;  %v376_v21 = vsel %vm361_vm0, %v333_v62, %v343_v63  ;;  %v405_v22 = vrot.slane %v307_v52, 2  ;;  %v1842_v23 = vmul.f32 %v1744_v5, %v1748_v6  ;;  %2407 = vst [vmem:[#allocation24_spill] sm:$0xff] %v1865_v43 }
  0x5d   : > { %833 = vmatpush.bf16.msra.mxu0 %v1086_v40  ;;  %1116 = vmatpush.bf16.msra.mxu1 %v1086_v40  ;;  %2405 = vst [vmem:[#allocation22_spill] sm:$0xff] %v1835_v20  ;;  %v718_v47 = vadd.f32 %v1819_v61, %v698_v12  ;;  %v1847_v25 = vsel %vm361_vm0, %v342_v2, %v352_v3  ;;  %v406_v29 = vrot.slane %v310_v57, 2 }
  0x5e   : > { %1117 = vmatpush.bf16.msra.mxu2 %v1086_v40  ;;  %1118 = vmatpush.bf16.msra.mxu3 %v1086_v40  ;;  %2406 = vst [vmem:[#allocation23_spill] sm:$0xff] %v1842_v23  ;;  %v719_v24 = vadd.f32 %v1819_v61, %v699_v16  ;;  %v1851_v9 = vsel %vm361_vm0, %v332_v1, %v342_v2  ;;  %v334_v2 = vrot.slane %v1865_v43, 1 }
  0x5f   : > { %v734_v27 = vmax.f32 %v718_v47, 0.0  ;;  %v366_v28 = vsel %vm361_vm0, %v343_v63, %v353_v14  ;;  %v442_v38 = vmul.f32 %v1693_v32, %v1795_v33  ;;  %v1859_v39 = vsel %vm412_vm1, %v385_v15, %v395_v18 }
  0x60   : > { %v735_v6 = vmax.f32 %v719_v24, 0.0  ;;  %v427_v40 = vsel %vm412_vm1, %v386_v17, %v396_v19  ;;  %v459_v30 = vmul.f32 %v1704_v36, %v376_v21  ;;  %v1869_v46 = vsel %vm412_vm1, %v395_v18, %v405_v22  ;;  %v1904_v24 = vld [vmem:[%s1651_s5 + $0x80] sm:$0xff] }
  0x61   : > { %2408 = vst [vmem:[#allocation25_spill] sm:$0xff] %v1869_v46  ;;  %v521_v48 = vmul.f32 %v1726_v54, %v1803_v49  ;;  %v522_v52 = vmul.f32 %v1726_v54, %v1806_v51  ;;  %v554_v55 = vmul.f32 %v1732_v59, %v1851_v9  ;;  %v443_v57 = vmul.f32 %v1693_v32, %v1798_v44 }
  0x62   : > { %v750_v56 = vpack.c.bf16 %v735_v6, %v734_v27  ;;  %v460_v60 = vmul.f32 %v1704_v36, %v366_v28  ;;  %v555_v62 = vmul.f32 %v1732_v59, %v1847_v25  ;;  %v417_v63 = vsel %vm412_vm1, %v396_v19, %v406_v29  ;;  %2409 = vst [vmem:[#allocation26_spill] sm:$0xff] %v1904_v24 }
  0x63   : > { %v537_v0 = vadd.f32 %v521_v48, %v504_v45  ;;  %v538_v1 = vadd.f32 %v522_v52, %v505_v53  ;;  %v475_v3 = vadd.f32 %v459_v30, %v442_v38  ;;  %v492_v12 = vmul.f32 %v1722_v50, %v427_v40  ;;  %v313_v30 = vld [vmem:[%s1651_s5 + $0x88] sm:$0xff]  ;;  %v1910_v48 = vld [vmem:[%s1651_s5 + $0x98] sm:$0xff]  ;;  %v316_v52 = vld [vmem:[%s1651_s5 + $0xa0] sm:$0xff] }
  0x64   : > { %834 = vmatmul.bf16.vlgmr.msra.gmra.mxu0 %v750_v56  ;;  %v587_v14 = vmul.f32 %v1744_v5, %v1859_v39  ;;  %v588_v15 = vmul.f32 %v1744_v5, %v1869_v46  ;;  %v620_v45 = vmul.f32 %v1756_v13, %v1795_v33  ;;  %v621_v53 = vmul.f32 %v1756_v13, %v1798_v44 }
  0x65   : > { %v570_v16 = vadd.f32 %v554_v55, %v537_v0  ;;  %v571_v17 = vadd.f32 %v555_v62, %v538_v1  ;;  %v1896_v18 = vmul.f32 %v1704_v36, %v1851_v9  ;;  %v1900_v19 = vmul.f32 %v1704_v36, %v1847_v25  ;;  %2410 = vst [vmem:[#allocation27_spill] sm:$0xff] %v1910_v48  ;;  %v1925_v62 = vld [vmem:[%s1651_s5 + $0x90] sm:$0xff] }
  0x66   : > { %v476_v47 = vadd.f32 %v460_v60, %v443_v57  ;;  %v493_v22 = vmul.f32 %v1722_v50, %v417_v63  ;;  %v653_v38 = vmul.f32 %v1768_v26, %v376_v21  ;;  %v654_v6 = vmul.f32 %v1768_v26, %v366_v28  ;;  %2414 = vst [vmem:[#allocation31_spill] sm:$0xff] %v1925_v62 }
  0x67   : > { %v603_v27 = vadd.f32 %v587_v14, %v570_v16  ;;  %v604_v29 = vadd.f32 %v588_v15, %v571_v17  ;;  %v1915_v55 = vmul.f32 %v1722_v50, %v1859_v39  ;;  %v1919_v56 = vmul.f32 %v1722_v50, %v1869_v46 }
  0x68   : > { %v508_v57 = vadd.f32 %v492_v12, %v475_v3  ;;  %v1922_v60 = vmul.f32 %v1732_v59, %v376_v21  ;;  %v686_v14 = vmul.f32 %v1774_v31, %v427_v40  ;;  %v687_v15 = vmul.f32 %v1774_v31, %v417_v63 }
  0x69   : > { %2411 = vst [vmem:[#allocation28_spill] sm:$0xff] %v1915_v55  ;;  %v636_v0 = vadd.f32 %v620_v45, %v603_v27  ;;  %v637_v1 = vadd.f32 %v621_v53, %v604_v29  ;;  %v344_v16 = vrot.slane %v1904_v24, 1  ;;  %v345_v17 = vrot.slane %v1910_v48, 1 }
  0x6a   : > { %2412 = vst [vmem:[#allocation29_spill] sm:$0xff] %v1919_v56  ;;  %v354_v23 = vrot.slane %v313_v30, 1  ;;  %v355_v20 = vrot.slane %v316_v52, 1  ;;  %v509_v46 = vadd.f32 %v493_v22, %v476_v47  ;;  %v335_v21 = vrot.slane %v1925_v62, 1 }
  0x6b   : > { %2413 = vst [vmem:[#allocation30_spill] sm:$0xff] %v1922_v60  ;;  %v669_v56 = vadd.f32 %v653_v38, %v636_v0  ;;  %v670_v3 = vadd.f32 %v654_v6, %v637_v1  ;;  %v1933_v12 = vmul.f32 %v1732_v59, %v366_v28  ;;  %v1936_v45 = vmul.f32 %v1744_v5, %v427_v40 }
  0x6c   : > { %v387_v53 = vrot.slane %v1865_v43, 2  ;;  %v397_v27 = vrot.slane %v1904_v24, 2  ;;  %v1941_v29 = vmul.f32 %v1744_v5, %v417_v63  ;;  %v407_v47 = vrot.slane %v313_v30, 2 }
  0x6d   : > { %2415 = vst [vmem:[#allocation32_spill] sm:$0xff] %v1933_v12  ;;  %v702_v60 = vadd.f32 %v686_v14, %v669_v56  ;;  %v703_v55 = vadd.f32 %v687_v15, %v670_v3  ;;  %v1945_v22 = vsel %vm361_vm0, %v344_v16, %v354_v23  ;;  %v1949_v28 = vsel %vm361_vm0, %v345_v17, %v355_v20 }
  0x6e   : > { %2416 = vst [vmem:[#allocation33_spill] sm:$0xff] %v1936_v45  ;;  %v1953_v40 = vsel %vm361_vm0, %v334_v2, %v344_v16  ;;  %v388_v38 = vrot.slane %v1925_v62, 2  ;;  %v1960_v30 = vsel %vm361_vm0, %v335_v21, %v345_v17  ;;  %v398_v23 = vrot.slane %v1910_v48, 2 }
  0x6f   : > { %2417 = vst [vmem:[#allocation34_spill] sm:$0xff] %v1941_v29  ;;  %v722_v63 = vadd.f32 %v1819_v61, %v702_v60  ;;  %v723_v6 = vadd.f32 %v1819_v61, %v703_v55  ;;  %v408_v56 = vrot.slane %v316_v52, 2  ;;  %v1965_v20 = vsel %vm412_vm1, %v387_v53, %v397_v27  ;;  %v2017_v29 = vld [vmem:[%s1651_s5 + $0xb0] sm:$0xff] }
  0x70   : > { %2418 = vst [vmem:[#allocation35_spill] sm:$0xff] %v1945_v22  ;;  %v446_v2 = vmul.f32 %v1693_v32, %v1925_v62  ;;  %v447_v0 = vmul.f32 %v1693_v32, %v1910_v48  ;;  %v1973_v55 = vsel %vm412_vm1, %v397_v27, %v407_v47  ;;  %v525_v14 = vmul.f32 %v1726_v54, %v1865_v43 }
  0x71   : > { %2419 = vst [vmem:[#allocation36_spill] sm:$0xff] %v1953_v40  ;;  %v738_v60 = vmax.f32 %v722_v63, 0.0  ;;  %v739_v1 = vmax.f32 %v723_v6, 0.0  ;;  %v463_v52 = vmul.f32 %v1704_v36, %v1960_v30  ;;  %v526_v15 = vmul.f32 %v1726_v54, %v1904_v24 }
  0x72   : > { %2420 = vst [vmem:[#allocation37_spill] sm:$0xff] %v1965_v20  ;;  %v558_v16 = vmul.f32 %v1732_v59, %v1953_v40  ;;  %v559_v17 = vmul.f32 %v1732_v59, %v1945_v22  ;;  %v1987_v21 = vsel %vm412_vm1, %v388_v38, %v398_v23  ;;  %v464_v53 = vmul.f32 %v1704_v36, %v1949_v28 }
  0x73   : > { %v752_v3 = vpack.c.bf16 %v739_v1, %v738_v60  ;;  %v541_v27 = vadd.f32 %v525_v14, %v508_v57  ;;  %v1993_v47 = vsel %vm412_vm1, %v398_v23, %v408_v56  ;;  %v542_v63 = vadd.f32 %v526_v15, %v509_v46 }
  0x74   : > { %v591_v6 = vmul.f32 %v1744_v5, %v1965_v20  ;;  %v592_v60 = vmul.f32 %v1744_v5, %v1973_v55  ;;  %v2001_v38 = vmul.f32 %v1704_v36, %v1953_v40  ;;  %v2005_v57 = vmul.f32 %v1704_v36, %v1945_v22  ;;  %v319_v36 = vld [vmem:[%s1651_s5 + $0xb8] sm:$0xff]  ;;  %v2036_v22 = vld [vmem:[%s1651_s5 + $0xc8] sm:$0xff] }
  0x75   : > { %844 = vmatmul.bf16.vlgmr.msra.gmra.mxu1 %v752_v3  ;;  %v574_v1 = vadd.f32 %v558_v16, %v541_v27  ;;  %v624_v23 = vmul.f32 %v1756_v13, %v1925_v62  ;;  %v479_v46 = vadd.f32 %v463_v52, %v446_v2  ;;  %v496_v56 = vmul.f32 %v1722_v50, %v1987_v21  ;;  %v2014_v3 = vld [vmem:[%s1651_s5 + $0xa8] sm:$0xff]  ;;  %v322_v62 = vld [vmem:[%s1651_s5 + $0xd0] sm:$0xff] }
  0x76   : > { %2421 = vst [vmem:[#allocation38_spill] sm:$0xff] %v2001_v38  ;;  %v575_v14 = vadd.f32 %v559_v17, %v542_v63  ;;  %v625_v15 = vmul.f32 %v1756_v13, %v1910_v48  ;;  %v497_v16 = vmul.f32 %v1722_v50, %v1993_v47  ;;  %v657_v2 = vmul.f32 %v1768_v26, %v1960_v30 }
  0x77   : > { %2422 = vst [vmem:[#allocation39_spill] sm:$0xff] %v2005_v57  ;;  %v480_v57 = vadd.f32 %v464_v53, %v447_v0  ;;  %v607_v27 = vadd.f32 %v591_v6, %v574_v1  ;;  %v2026_v52 = vmul.f32 %v1722_v50, %v1965_v20  ;;  %v658_v63 = vmul.f32 %v1768_v26, %v1949_v28  ;;  %v2033_v53 = vld [vmem:[%s1651_s5 + $0xc0] sm:$0xff] }
  0x78   : > { %v608_v17 = vadd.f32 %v592_v60, %v575_v14  ;;  %v690_v48 = vmul.f32 %v1774_v31, %v1987_v21  ;;  %v336_v6 = vrot.slane %v2014_v3, 1  ;;  %v346_v1 = vrot.slane %v2017_v29, 1 }
  0x79   : > { %2423 = vst [vmem:[#allocation40_spill] sm:$0xff] %v2026_v52  ;;  %v640_v0 = vadd.f32 %v624_v23, %v607_v27  ;;  %v356_v45 = vrot.slane %v319_v36, 1  ;;  %v2042_v20 = vmul.f32 %v1722_v50, %v1973_v55  ;;  %v512_v60 = vadd.f32 %v496_v56, %v479_v46 }
  0x7a   : > { %v641_v14 = vadd.f32 %v625_v15, %v608_v17  ;;  %v691_v52 = vmul.f32 %v1774_v31, %v1993_v47  ;;  %v513_v23 = vadd.f32 %v497_v16, %v480_v57  ;;  %v389_v38 = vrot.slane %v2014_v3, 2 }
  0x7b   : > { %2424 = vst [vmem:[#allocation41_spill] sm:$0xff] %v2042_v20  ;;  %v673_v27 = vadd.f32 %v657_v2, %v640_v0  ;;  %v399_v12 = vrot.slane %v2017_v29, 2  ;;  %v337_v24 = vrot.slane %v2033_v53, 1  ;;  %v347_v43 = vrot.slane %v2036_v22, 1 }
  0x7c   : > { %v674_v40 = vadd.f32 %v658_v63, %v641_v14  ;;  %v409_v34 = vrot.slane %v319_v36, 2  ;;  %v357_v20 = vrot.slane %v322_v62, 1  ;;  %v2053_v46 = vsel %vm361_vm0, %v346_v1, %v356_v45 }
  0x7d   : > { %v706_v50 = vadd.f32 %v690_v48, %v673_v27  ;;  %v2057_v57 = vsel %vm361_vm0, %v336_v6, %v346_v1  ;;  %v390_v15 = vrot.slane %v2033_v53, 2  ;;  %v400_v16 = vrot.slane %v2036_v22, 2 }
  0x7e   : > { %v707_v56 = vadd.f32 %v691_v52, %v674_v40  ;;  %v410_v2 = vrot.slane %v322_v62, 2  ;;  %v2064_v36 = vsel %vm412_vm1, %v399_v12, %v409_v34  ;;  %v2068_v48 = vsel %vm412_vm1, %v389_v38, %v399_v12 }
  0x7f   : > { %v726_v17 = vadd.f32 %v1819_v61, %v706_v50  ;;  %v529_v45 = vmul.f32 %v1726_v54, %v2014_v3  ;;  %v530_v52 = vmul.f32 %v1726_v54, %v2017_v29  ;;  %v562_v62 = vmul.f32 %v1732_v59, %v2057_v57 }
  0x80   : > { %v727_v40 = vadd.f32 %v1819_v61, %v707_v56  ;;  %v563_v50 = vmul.f32 %v1732_v59, %v2053_v46  ;;  %v2081_v34 = vmul.f32 %v1732_v59, %v1960_v30  ;;  %v2085_v38 = vsel %vm361_vm0, %v337_v24, %v347_v43 }
  0x81   : > { %v742_v12 = vmax.f32 %v726_v17, 0.0  ;;  %v545_v63 = vadd.f32 %v529_v45, %v512_v60  ;;  %v546_v6 = vadd.f32 %v530_v52, %v513_v23  ;;  %v595_v1 = vmul.f32 %v1744_v5, %v2068_v48 }
  0x82   : > { %v743_v0 = vmax.f32 %v727_v40, 0.0  ;;  %v596_v14 = vmul.f32 %v1744_v5, %v2064_v36  ;;  %v2093_v27 = vsel %vm361_vm0, %v347_v43, %v357_v20  ;;  %v2097_v30 = vsel %vm412_vm1, %v400_v16, %v410_v2 }
  0x83   : > { %v578_v56 = vadd.f32 %v562_v62, %v545_v63  ;;  %v628_v24 = vmul.f32 %v1756_v13, %v2033_v53  ;;  %v2103_v23 = vsel %vm412_vm1, %v390_v15, %v400_v16  ;;  %v579_v17 = vadd.f32 %v563_v50, %v546_v6 }
  0x84   : > { %v754_v60 = vpack.c.bf16 %v743_v0, %v742_v12  ;;  %v629_v45 = vmul.f32 %v1756_v13, %v2036_v22  ;;  %v2109_v43 = vmul.f32 %v1732_v59, %v1949_v28  ;;  %v2113_v20 = vmul.f32 %v1744_v5, %v1987_v21 }
  0x85   : > { %v611_v2 = vadd.f32 %v595_v1, %v578_v56  ;;  %v661_v40 = vmul.f32 %v1768_v26, %v2085_v38  ;;  %v612_v52 = vadd.f32 %v596_v14, %v579_v17  ;;  %v662_v15 = vmul.f32 %v1768_v26, %v2093_v27 }
  0x86   : > { %854 = vmatmul.bf16.vlgmr.msra.gmra.mxu2 %v754_v60  ;;  %v436_v16 = vmul.f32 %v1693_v32, %v1659_v7  ;;  %v437_v28 = vmul.f32 %v1693_v32, %v1662_v8  ;;  %v694_v21 = vmul.f32 %v1774_v31, %v2103_v23  ;;  %v695_v50 = vmul.f32 %v1774_v31, %v2097_v30 }
  0x87   : > { %v644_v62 = vadd.f32 %v628_v24, %v611_v2  ;;  %v519_v12 = vmul.f32 %v1726_v54, %v1668_v10  ;;  %v645_v63 = vadd.f32 %v629_v45, %v612_v52  ;;  %v520_v7 = vmul.f32 %v1726_v54, %v1671_v11 }
  0x88   : > { %v469_v0 = vadd.f32 %v1778_v35, %v436_v16  ;;  %v470_v6 = vadd.f32 %v1782_v37, %v437_v28  ;;  %v618_v8 = vmul.f32 %v1756_v13, %v1803_v49  ;;  %v619_v14 = vmul.f32 %v1756_v13, %v1806_v51  ;;  %v2426_v28 = vld [vmem:[#allocation28_spill] sm:$0xff] }
  0x89   : > { %v677_v1 = vadd.f32 %v661_v40, %v644_v62  ;;  %v651_v56 = vmul.f32 %v1768_v26, %v1851_v9  ;;  %v678_v24 = vadd.f32 %v662_v15, %v645_v63  ;;  %v440_v37 = vmul.f32 %v1693_v32, %v1803_v49 }
  0x8a   : > { %v502_v10 = vadd.f32 %v1787_v41, %v469_v0  ;;  %v503_v35 = vadd.f32 %v1790_v42, %v470_v6  ;;  %v652_v11 = vmul.f32 %v1768_v26, %v1847_v25  ;;  %v441_v17 = vmul.f32 %v1693_v32, %v1806_v51  ;;  %v2430_v6 = vld [vmem:[#allocation22_spill] sm:$0xff] }
  0x8b   : > { %v710_v60 = vadd.f32 %v694_v21, %v677_v1  ;;  %v523_v45 = vmul.f32 %v1726_v54, %v1795_v33  ;;  %v711_v2 = vadd.f32 %v695_v50, %v678_v24  ;;  %v473_v41 = vadd.f32 %v1896_v18, %v440_v37  ;;  %v2425_v33 = vld [vmem:[#allocation21_spill] sm:$0xff]  ;;  %v2433_v37 = vld [vmem:[#allocation36_spill] sm:$0xff] }
  0x8c   : > { %v535_v9 = vadd.f32 %v519_v12, %v502_v10  ;;  %v536_v40 = vadd.f32 %v520_v7, %v503_v35  ;;  %v684_v49 = vmul.f32 %v1774_v31, %v1859_v39  ;;  %v474_v52 = vadd.f32 %v1900_v19, %v441_v17  ;;  %v2427_v18 = vld [vmem:[#allocation25_spill] sm:$0xff]  ;;  %v2429_v39 = vld [vmem:[#allocation24_spill] sm:$0xff]  ;;  %v2431_v7 = vld [vmem:[#allocation23_spill] sm:$0xff] }
  0x8d   : > { %v730_v42 = vadd.f32 %v1819_v61, %v710_v60  ;;  %v524_v25 = vmul.f32 %v1726_v54, %v1798_v44  ;;  %v731_v51 = vadd.f32 %v1819_v61, %v711_v2  ;;  %v506_v62 = vadd.f32 %v2426_v28, %v473_v41  ;;  %v2428_v12 = vld [vmem:[#allocation29_spill] sm:$0xff]  ;;  %v2432_v10 = vld [vmem:[#allocation26_spill] sm:$0xff] }
  0x8e   : > { %v568_v15 = vadd.f32 %v1814_v58, %v535_v9  ;;  %v569_v16 = vadd.f32 %v2425_v33, %v536_v40  ;;  %v685_v50 = vmul.f32 %v1774_v31, %v2427_v18  ;;  %v507_v63 = vadd.f32 %v2428_v12, %v474_v52  ;;  %v2434_v41 = vld [vmem:[#allocation30_spill] sm:$0xff]  ;;  %v2435_v52 = vld [vmem:[#allocation32_spill] sm:$0xff]  ;;  %v2437_v33 = vld [vmem:[#allocation31_spill] sm:$0xff] }
  0x8f   : > { %v746_v21 = vmax.f32 %v730_v42, 0.0  ;;  %v622_v19 = vmul.f32 %v1756_v13, %v2429_v39  ;;  %v747_v0 = vmax.f32 %v731_v51, 0.0  ;;  %v539_v24 = vadd.f32 %v523_v45, %v506_v62  ;;  %v2438_v18 = vld [vmem:[#allocation33_spill] sm:$0xff] }
  0x90   : > { %v601_v44 = vadd.f32 %v2430_v6, %v568_v15  ;;  %v602_v1 = vadd.f32 %v2431_v7, %v569_v16  ;;  %v540_v58 = vadd.f32 %v524_v25, %v507_v63  ;;  %v623_v35 = vmul.f32 %v1756_v13, %v2432_v10  ;;  %v2436_v25 = vld [vmem:[#allocation38_spill] sm:$0xff]  ;;  %v2442_v6 = vld [vmem:[#allocation40_spill] sm:$0xff]  ;;  %v2443_v7 = vld [vmem:[#allocation27_spill] sm:$0xff] }
  0x91   : > { %v655_v60 = vmul.f32 %v1768_v26, %v2433_v37  ;;  %v444_v17 = vmul.f32 %v1693_v32, %v2429_v39  ;;  %v756_v2 = vpack.c.bf16 %v747_v0, %v746_v21  ;;  %v572_v42 = vadd.f32 %v2434_v41, %v539_v24  ;;  %v2439_v21 = vld [vmem:[#allocation35_spill] sm:$0xff]  ;;  %v2444_v37 = vld [vmem:[#allocation37_spill] sm:$0xff] }
  0x92   : > { %v634_v9 = vadd.f32 %v618_v8, %v601_v44  ;;  %v635_v40 = vadd.f32 %v619_v14, %v602_v1  ;;  %v573_v51 = vadd.f32 %v2435_v52, %v540_v58  ;;  %v445_v45 = vmul.f32 %v1693_v32, %v2432_v10  ;;  %v2440_v14 = vld [vmem:[#allocation34_spill] sm:$0xff]  ;;  %v2441_v39 = vld [vmem:[#allocation39_spill] sm:$0xff] }
  0x93   : > { %v477_v15 = vadd.f32 %v2436_v25, %v444_v17  ;;  %v527_v16 = vmul.f32 %v1726_v54, %v2437_v33  ;;  %864 = vmatmul.bf16.vlgmr.msra.gmra.mxu3 %v756_v2  ;;  %v605_v12 = vadd.f32 %v2438_v18, %v572_v42  ;;  %v656_v8 = vmul.f32 %v1768_v26, %v2439_v21  ;;  %v2445_v2 = vld [vmem:[#allocation41_spill] sm:$0xff] }
  0x94   : > { %v667_v28 = vadd.f32 %v651_v56, %v634_v9  ;;  %v668_v62 = vadd.f32 %v652_v11, %v635_v40  ;;  %v606_v63 = vadd.f32 %v2440_v14, %v573_v51  ;;  %v478_v0 = vadd.f32 %v2441_v39, %v445_v45 }
  0x95   : > { %v510_v44 = vadd.f32 %v2442_v6, %v477_v15  ;;  %v528_v1 = vmul.f32 %v1726_v54, %v2443_v7  ;;  %v638_v10 = vadd.f32 %v622_v19, %v605_v12  ;;  %v688_v56 = vmul.f32 %v1774_v31, %v2444_v37  ;;  %v323_v6 = vld [vmem:[%s1651_s5 + $0xd8] sm:$0xff] }
  0x96   : > { %v700_v24 = vadd.f32 %v684_v49, %v667_v28  ;;  %v701_v58 = vadd.f32 %v685_v50, %v668_v62  ;;  %v639_v11 = vadd.f32 %v623_v35, %v606_v63  ;;  %v689_v17 = vmul.f32 %v1774_v31, %v1973_v55  ;;  %v2447_v63 = vld [vmem:[#allocation20_spill] sm:$0xff] }
  0x97   : > { %v511_v9 = vadd.f32 %v2445_v2, %v478_v0  ;;  %v543_v40 = vadd.f32 %v527_v16, %v510_v44  ;;  %v594_v41 = vmul.f32 %v1744_v5, %v1993_v47  ;;  %v671_v49 = vadd.f32 %v655_v60, %v638_v10  ;;  %v324_v10 = vld [vmem:[%s1651_s5 + $0xe0] sm:$0xff] }
  0x98   : > { %v720_v42 = vadd.f32 %v1819_v61, %v700_v24  ;;  %v721_v52 = vadd.f32 %v1819_v61, %v701_v58  ;;  %v672_v50 = vadd.f32 %v656_v8, %v639_v11  ;;  %v626_v35 = vmul.f32 %v1756_v13, %v2014_v3 }
  0x99   : > { %v544_v19 = vadd.f32 %v528_v1, %v511_v9  ;;  %v576_v51 = vadd.f32 %v2081_v34, %v543_v40  ;;  %v704_v25 = vadd.f32 %v688_v56, %v671_v49  ;;  %v627_v15 = vmul.f32 %v1756_v13, %v2017_v29 }
  0x9a   : > { %v736_v45 = vmax.f32 %v720_v42, 0.0  ;;  %v737_v55 = vmax.f32 %v721_v52, 0.0  ;;  %v705_v33 = vadd.f32 %v689_v17, %v672_v50  ;;  %v659_v60 = vmul.f32 %v1768_v26, %v2057_v57 }
  0x9b   : > { %v577_v47 = vadd.f32 %v2109_v43, %v544_v19  ;;  %v609_v16 = vadd.f32 %v2113_v20, %v576_v51  ;;  %v724_v34 = vadd.f32 %v1819_v61, %v704_v25  ;;  %v660_v62 = vmul.f32 %v1768_v26, %v2053_v46  ;;  %v2446_v20 = vld [vmem:[#allocation19_spill] sm:$0xff] }
  0x9c   : > { %v751_v28 = vpack.c.bf16 %v737_v55, %v736_v45  ;;  %v725_v18 = vadd.f32 %v1819_v61, %v705_v33  ;;  %v692_v43 = vmul.f32 %v1774_v31, %v2068_v48  ;;  %v465_v8 = vmul.f32 %v2446_v20, %v2057_v57 }
  0x9d   : > { %v610_v12 = vadd.f32 %v594_v41, %v577_v47  ;;  %v642_v21 = vadd.f32 %v626_v35, %v609_v16  ;;  %v466_v14 = vmul.f32 %v2446_v20, %v2053_v46  ;;  %v498_v39 = vmul.f32 %v2447_v63, %v2068_v48  ;;  %v325_v46 = vld [vmem:[%s1651_s5 + $0xe8] sm:$0xff]  ;;  %s925_s5 = sshll.u32 %s922_s1, 4  ;;  %s926_s5 = int_to_ptr.hbm [resolvable:$true] %s925_s5 }
  0x9e   : > { %839 = vmatmul.bf16.gmra.mxu0 %v751_v28  ;;  %v740_v0 = vmax.f32 %v724_v34, 0.0  ;;  %v741_v44 = vmax.f32 %v725_v18, 0.0  ;;  %v693_v24 = vmul.f32 %v1774_v31, %v2064_v36  ;;  %v499_v58 = vmul.f32 %v2447_v63, %v2064_v36  ;;  %s1357_s6 = sshra.s32 %s926_s5, 4  ;;  %s1358_s6 = int_to_ptr.hbm [resolvable:$true] %s1357_s6 }
  0x9f   : > { %v643_v7 = vadd.f32 %v627_v15, %v610_v12  ;;  %v675_v1 = vadd.f32 %v659_v60, %v642_v21  ;;  %v564_v57 = vmul.f32 %v1732_v59, %v2085_v38  ;;  %v448_v48 = vmul.f32 %v1693_v32, %v2014_v3  ;;  %s1359_s8 = scalar_lea.hbm %s1358_s6, 128  ;;  %p1364_p0 = scmp.lt.s32.totalorder %s1358_s6, %s2450_s9 }
  0xa0   : > { %v449_v37 = vmul.f32 %v1693_v32, %v2017_v29  ;;  %v753_v56 = vpack.c.bf16 %v741_v44, %v740_v0  ;;  %v338_v2 = vrot.slane %v323_v6, 1  ;;  %v531_v36 = vmul.f32 %v1726_v54, %v2033_v53  ;;  %p1360_p1 = scmp.ne.s32.totalorder %s1358_s6, %s1359_s8  ;;  %p1365_p2 = scmp.lt.s32.totalorder %s1363_s11, %s1359_s8 }
  0xa1   : > { %v676_v11 = vadd.f32 %v660_v62, %v643_v7  ;;  %v708_v17 = vadd.f32 %v692_v43, %v675_v1  ;;  %v481_v9 = vadd.f32 %v465_v8, %v448_v48  ;;  %v532_v38 = vmul.f32 %v1726_v54, %v2036_v22 }
  0xa2   : > { %v482_v40 = vadd.f32 %v466_v14, %v449_v37  ;;  %849 = vmatmul.bf16.gmra.mxu1 %v753_v56  ;;  %v348_v3 = vrot.slane %v324_v10, 1  ;;  %v358_v52 = vrot.slane %v325_v46, 1  ;;  %v565_v32 = vmul.f32 %v1732_v59, %v2093_v27  ;;  %p1361_p4 = pnand %p1360_p1, %p1579_p6  ;;  %p1366_p3 = por %p1365_p2, %p1364_p0 }
  0xa3   : > { %v709_v41 = vadd.f32 %v693_v24, %v676_v11  ;;  %v728_v42 = vadd.f32 %v1819_v61, %v708_v17  ;;  %v391_v29 = vrot.slane %v323_v6, 2  ;;  %v514_v49 = vadd.f32 %v498_v39, %v481_v9 }
  0xa4   : > { %v515_v50 = vadd.f32 %v499_v58, %v482_v40  ;;  %v401_v35 = vrot.slane %v324_v10, 2  ;;  %v411_v53 = vrot.slane %v325_v46, 2  ;;  %v597_v54 = vmul.f32 %v1744_v5, %v2103_v23  ;;  %p1362_p11 = pneg %p1361_p4 }
  0xa5   : > { %v729_v19 = vadd.f32 %v1819_v61, %v709_v41  ;;  %v744_v51 = vmax.f32 %v728_v42, 0.0  ;;  %v598_v22 = vmul.f32 %v1744_v5, %v2097_v30  ;;  %v547_v45 = vadd.f32 %v531_v36, %v514_v49 }
  0xa6   : > { %v548_v55 = vadd.f32 %v532_v38, %v515_v50  ;;  %v371_v59 = vsel %vm361_vm0, %v348_v3, %v358_v52  ;;  %v381_v27 = vsel %vm361_vm0, %v338_v2, %v348_v3  ;;  %v630_v47 = vmul.f32 %v1756_v13, %v323_v6  ;;  %v2263_v6 = vld [vmem:[%s2360_s4] ss:$0 sm:$0xff]  ;;  %p1367_p5 = pnand %p1366_p3, %p1362_p11 }
  0xa7   : > { %v745_v25 = vmax.f32 %v729_v19, 0.0  ;;  %v580_v15 = vadd.f32 %v564_v57, %v547_v45  ;;  %v631_v16 = vmul.f32 %v1756_v13, %v324_v10  ;;  %v422_v23 = vsel %vm412_vm1, %v401_v35, %v411_v53 }
  0xa8   : > { %v581_v33 = vadd.f32 %v565_v32, %v548_v55  ;;  %v432_v5 = vsel %vm412_vm1, %v391_v29, %v401_v35  ;;  %v663_v34 = vmul.f32 %v1768_v26, %v381_v27  ;;  %v664_v62 = vmul.f32 %v1768_v26, %v371_v59 }
  0xa9   : > { %v755_v60 = vpack.c.bf16 %v745_v25, %v744_v51  ;;  %v613_v30 = vadd.f32 %v597_v54, %v580_v15  ;;  %v696_v13 = vmul.f32 %v1774_v31, %v432_v5  ;;  %v697_v21 = vmul.f32 %v1774_v31, %v422_v23 }
  0xaa   : > { %v614_v28 = vadd.f32 %v598_v22, %v581_v33 }
  0xab   : > { %859 = vmatmul.bf16.gmra.mxu2 %v755_v60  ;;  %v646_v18 = vadd.f32 %v630_v47, %v613_v30 }
  0xac   : > { %v647_v12 = vadd.f32 %v631_v16, %v614_v28 }
  0xad   : > { %v679_v43 = vadd.f32 %v663_v34, %v646_v18 }
  0xae   : > { %v680_v20 = vadd.f32 %v664_v62, %v647_v12 }
  0xaf   : > { %v712_v8 = vadd.f32 %v696_v13, %v679_v43 }
  0xb0   : > { %v713_v4 = vadd.f32 %v697_v21, %v680_v20 }
  0xb1   : > { %v732_v14 = vadd.f32 %v1819_v61, %v712_v8 }
  0xb2   : > { %v733_v63 = vadd.f32 %v1819_v61, %v713_v4 }
  0xb3   : > { %v748_v39 = vmax.f32 %v732_v14, 0.0 }
  0xb4   : > { %v749_v0 = vmax.f32 %v733_v63, 0.0 }
  0xb6   : > { %v757_v26 = vpack.c.bf16 %v749_v0, %v748_v39 }
  0xb8   : > { %869 = vmatmul.bf16.gmra.mxu3 %v757_v26 }
  0xe1   : > { %v835_v31 = vpop.f32.mrf.mxu0 }
  0xe2   : > { %v836_v44 = vadd.f32 %v2263_v6, %v835_v31 }
  0xe4   : > { %v875_v7 = vmax.f32 %v836_v44, 0.0 }
  0xe6   : > { %891 = vst [vmem:[%s2268_s15] sm:$0xff] %v875_v7 }
  0xe9   : > { %v837_v58 = vpop.f32.mrf.mxu0 }
  0xea   : > { %v838_v10 = vadd.f32 %v2263_v6, %v837_v58 }
  0xec   : > { %v876_v48 = vmax.f32 %v838_v10, 0.0 }
  0xee   : > { %892 = vst [vmem:[%s2268_s15 + $0x8] sm:$0xff] %v876_v48 }
  0xf2   : > { %v845_v61 = vpop.f32.mrf.mxu1 }
  0xf3   : > { %v846_v1 = vadd.f32 %v2263_v6, %v845_v61 }
  0xf5   : > { %v879_v24 = vmax.f32 %v846_v1, 0.0 }
  0xf7   : > { %895 = vst [vmem:[%s2268_s15 + $0x20] sm:$0xff] %v879_v24 }
  0xfa   : > { %v847_v57 = vpop.f32.mrf.mxu1 }
  0xfb   : > { %v848_v46 = vadd.f32 %v2263_v6, %v847_v57 }
  0xfd   : > { %v880_v37 = vmax.f32 %v848_v46, 0.0 }
  0xff   : > { %896 = vst [vmem:[%s2268_s15 + $0x28] sm:$0xff] %v880_v37 }
 0x109   : > { %v855_v56 = vpop.f32.mrf.mxu2 }
 0x10a   : > { %v856_v11 = vadd.f32 %v2263_v6, %v855_v56 }
 0x10c   : > { %v883_v17 = vmax.f32 %v856_v11, 0.0 }
 0x10e   : > { %899 = vst [vmem:[%s2268_s15 + $0x40] sm:$0xff] %v883_v17 }
 0x111   : > { %v857_v2 = vpop.f32.mrf.mxu2 }
 0x112   : > { %v858_v9 = vadd.f32 %v2263_v6, %v857_v2 }
 0x114   : > { %v884_v40 = vmax.f32 %v858_v9, 0.0 }
 0x116   : > { %900 = vst [vmem:[%s2268_s15 + $0x48] sm:$0xff] %v884_v40  ;;  %v865_v36 = vpop.f32.mrf.mxu3 }
 0x117   : > { %v866_v38 = vadd.f32 %v2263_v6, %v865_v36 }
 0x119   : > { %v887_v41 = vmax.f32 %v866_v38, 0.0 }
 0x11b   : > { %v840_v42 = vpop.f32.mrf.mxu0  ;;  %903 = vst [vmem:[%s2268_s15 + $0x60] sm:$0xff] %v887_v41 }
 0x11c   : > { %v841_v3 = vadd.f32 %v2263_v6, %v840_v42 }
 0x11e   : > { %v877_v52 = vmax.f32 %v841_v3, 0.0  ;;  %v867_v32 = vpop.f32.mrf.mxu3 }
 0x11f   : > { %v868_v29 = vadd.f32 %v2263_v6, %v867_v32  ;;  %v850_v49 = vpop.f32.mrf.mxu1 }
 0x120   : > { %893 = vst [vmem:[%s2268_s15 + $0x10] sm:$0xff] %v877_v52  ;;  %v851_v50 = vadd.f32 %v2263_v6, %v850_v49 }
 0x121   : > { %v888_v19 = vmax.f32 %v868_v29, 0.0 }
 0x122   : > { %v881_v51 = vmax.f32 %v851_v50, 0.0 }
 0x123   : > { %v842_v35 = vpop.f32.mrf.mxu0  ;;  %904 = vst [vmem:[%s2268_s15 + $0x68] sm:$0xff] %v888_v19 }
 0x124   : > { %v843_v53 = vadd.f32 %v2263_v6, %v842_v35  ;;  %897 = vst [vmem:[%s2268_s15 + $0x30] sm:$0xff] %v881_v51 }
 0x126   : > { %v878_v54 = vmax.f32 %v843_v53, 0.0 }
 0x127   : > { %v852_v22 = vpop.f32.mrf.mxu1 }
 0x128   : > { %894 = vst [vmem:[%s2268_s15 + $0x18] sm:$0xff] %v878_v54  ;;  %v853_v45 = vadd.f32 %v2263_v6, %v852_v22 }
 0x12a   : > { %v882_v55 = vmax.f32 %v853_v45, 0.0 }
 0x12c   : > { %898 = vst [vmem:[%s2268_s15 + $0x38] sm:$0xff] %v882_v55 }
 0x12e   : > { %v860_v25 = vpop.f32.mrf.mxu2 }
 0x12f   : > { %v861_v59 = vadd.f32 %v2263_v6, %v860_v25 }
 0x131   : > { %v885_v27 = vmax.f32 %v861_v59, 0.0 }
 0x133   : > { %901 = vst [vmem:[%s2268_s15 + $0x50] sm:$0xff] %v885_v27 }
 0x136   : > { %v862_v15 = vpop.f32.mrf.mxu2 }
 0x137   : > { %v863_v33 = vadd.f32 %v2263_v6, %v862_v15 }
 0x139   : > { %v886_v47 = vmax.f32 %v863_v33, 0.0 }
 0x13b   : > { %v870_v16 = vpop.f32.mrf.mxu3  ;;  %902 = vst [vmem:[%s2268_s15 + $0x58] sm:$0xff] %v886_v47 }
 0x13c   : > { %v871_v60 = vadd.f32 %v2263_v6, %v870_v16 }
 0x13e   : > { %v889_v23 = vmax.f32 %v871_v60, 0.0 }
 0x140   : > { %905 = vst [vmem:[%s2268_s15 + $0x70] sm:$0xff] %v889_v23 }
 0x143   : > { %v872_v5 = vpop.f32.mrf.mxu3 }
 0x144   : > { %v873_v30 = vadd.f32 %v2263_v6, %v872_v5 }
 0x146   : > { %v890_v28 = vmax.f32 %v873_v30, 0.0 }
 0x148   : > { %906 = vst [vmem:[%s2268_s15 + $0x78] sm:$0xff] %v890_v28 }
 0x149   : > { %1370 = shalt.err (!%p1367_p5)
}
 0x14a   : > { %s1477_s7 = smov 128   ;;  %s1478_s15 = smov 8  }
 0x14b   : > { %1132 = dma.vmem_to_hbm [thread:$0]  (%p1579_p6), %s924_s24, 2048, %s926_s5, %s908_s25, %s1477_s7, %s1477_s7, %s1478_s15  }
 0x14c PF: > { %s2452_s12 = sld [smem:[#allocation12_spill]]  ;;  %p1154_p7 = scmp.ge.s32.totalorder %s1469_s28, 2 }
 0x14e   : > { %p1146_p8 = pnand %p1154_p7, %p1585_p10 }
 0x150   : > { %p1147_p9 = pneg %p1146_p8 }
 0x152   : > { %s940_s30 = sand.u32 1, %s2452_s12  }
 0x153   : > { %s941_s17 = scalar_lea.sflag [#allocation4], %s940_s30 }
 0x154   : > { %1424 = dma.done.wait (%p1147_p9), %s941_s17, 2048  }
 0x155   : > { %1426 = vsyncadd (%p1147_p9), %s941_s17, 4294965248  ;;  %s22_s28 = sadd.s32 1, %s1469_s28   ;;  %s2454_s24 = sld [smem:[#allocation14_spill]] }
 0x156   : > { %p19_p12 = scmp.ge.s32.totalorder %s22_s28, 6   ;;  %s2455_s26 = sld [smem:[#allocation17_spill]] }
 0x157   : > { %s2456_s1 = sld [smem:[#allocation18_spill]]  ;;  %s2457_s18 = smov %s1433_s19 }
 0x158   : > { %s2458_s19 = smov %s1437_s20  ;;  %s2459_s20 = smov %s1630_s14 }
 0x159   : > { %s2460_s21 = smov %s1445_s22  ;;  %s2461_s22 = smov %s1449_s23 }
 0x15a   : > { %s2462_s23 = smov %s1627_s3  ;;  %s2463_s25 = smov %s1465_s27 }
 0x15b   :  { %21 = sbr.rel (!%p19_p12) target bundleno = 14 (0xe), region = 94 }
 0x15d   : > { %s2464_s27 = smov %s2456_s1 }
 0x160   :  { %947 = vsyncpa [#allocation3], 1 }
 0x161   :  { %949 = vsyncpa [#allocation3 + $0x1], 1 }
 0x162   :  { %950 = vsyncpa [#allocation6], 1 }
 0x163   :  { %951 = vsyncpa [#allocation4], 1 }
 0x164   :  { %953 = vsyncpa [#allocation4 + $0x1], 1 }

</bundles_post_ra>
